<compile_context>
chip_gen: v7x
topology: tpu7x:2x2x1
jax: 0.10.0
libtpu: 0.0.40
codegen_flags: <defaults>
</compile_context>

<pallas_src>
import functools

import jax
import jax.numpy as jnp
from jax.experimental import pallas as pl
from jax.experimental.pallas import tpu as pltpu


# ----------------------------------------------------------------------------
# Fused SELayer kernel: one grid step == Bt batch elements.
#   x_ref : (Bt, C, HWp)  activation tile (VMEM)
#   w1_ref: (Cr, C)       fc1 weight, PyTorch (out, in) layout, no bias
#   w2_ref: (C, Cr)       fc2 weight, PyTorch (out, in) layout, no bias
#   o_ref : (Bt, C, HWp)  output tile
# ----------------------------------------------------------------------------
def _se_kernel(x_ref, w1_ref, w2_ref, o_ref, *, inv_hw):
    # Squeeze: per-channel mean over the spatial (lane) axis.  Padded lanes
    # (if any) are zero so they do not perturb the sum; inv_hw uses true HW.
    y = jnp.sum(x_ref[...].astype(jnp.float32), axis=2) * inv_hw        # (Bt, C)

    # Excitation: batched FC1 -> ReLU -> FC2 -> sigmoid.  Contracting the
    # in_features dim uses the (out, in) weight layout directly: no transposes.
    z = jax.lax.dot_general(y, w1_ref[...],
                            dimension_numbers=(((1,), (1,)), ((), ())),
                            preferred_element_type=jnp.float32)          # (Bt, Cr)
    z = jnp.maximum(z, 0.0)
    s = jax.lax.dot_general(z, w2_ref[...],
                            dimension_numbers=(((1,), (1,)), ((), ())),
                            preferred_element_type=jnp.float32)          # (Bt, C)
    s = jax.nn.sigmoid(s)

    # Scale: re-read x from VMEM (cheap) and broadcast the gate over HW.
    o_ref[...] = (x_ref[...] * s[:, :, None].astype(o_ref.dtype))


def se_layer(x, w1, w2, *, block_batch=None, donate_x=False):
    """SELayer forward.  x: (B, C, H, W) NCHW; w1: (C//r, C); w2: (C, C//r)."""
    B, C, H, W = x.shape
    Cr = w1.shape[0]
    hw = H * W
    itemsize = jnp.dtype(x.dtype).itemsize

    # Lane-density guard: pad the flattened spatial axis to a multiple of 128
    # so output stores are unmasked vst (no-op when HW is already 128-aligned).
    pad = (-hw) % 128
    hw_p = hw + pad
    x3 = x.reshape(B, C, hw)                                   # free reshape
    if pad:
        x3 = jnp.pad(x3, ((0, 0), (0, 0), (0, pad)))

    # --- Pick Bt: largest divisor of B fitting a conservative VMEM budget,
    # --- preferring >= 2 grid steps (v7x has 2 TCs on the "parallel" axis).
    if block_batch is None:
        per_elem = C * hw_p * itemsize
        budget = 24 << 20                       # bytes for 2x(in)+2x(out) blocks
        max_bt = max(1, budget // (4 * per_elem))
        cands = [d for d in range(1, B + 1) if B % d == 0 and d <= max_bt]
        two_step = [d for d in cands if B // d >= 2]
        block_batch = max(two_step) if two_step else max(cands)
    assert B % block_batch == 0, (B, block_batch)
    grid_b = B // block_batch

    block_bytes = block_batch * C * hw_p * itemsize
    w_bytes = (w1.size * jnp.dtype(w1.dtype).itemsize
               + w2.size * jnp.dtype(w2.dtype).itemsize)
    # double-buffered in + out blocks + weights + slack; v5e's default scoped
    # limit is only 16 MiB, so raise it explicitly (capped well under v7x VMEM).
    vmem_limit = int(min(max(4 * block_bytes + 2 * w_bytes + (4 << 20),
                             16 << 20), 64 << 20))

    flops = B * (C * hw + 2 * Cr * C + 2 * C * Cr + C * hw)
    bytes_accessed = 2 * x3.size * itemsize + w_bytes

    out = pl.pallas_call(
        functools.partial(_se_kernel, inv_hw=1.0 / hw),
        out_shape=jax.ShapeDtypeStruct((B, C, hw_p), x.dtype),
        grid=(grid_b,),
        in_specs=[
            pl.BlockSpec((block_batch, C, hw_p), lambda b: (b, 0, 0)),
            pl.BlockSpec((Cr, C), lambda b: (0, 0)),            # fc1 weight
            pl.BlockSpec((C, Cr), lambda b: (0, 0)),            # fc2 weight
        ],
        out_specs=pl.BlockSpec((block_batch, C, hw_p), lambda b: (b, 0, 0)),
        compiler_params=pltpu.CompilerParams(
            dimension_semantics=("parallel",),                  # v7x: 2 TCs
            vmem_limit_bytes=vmem_limit),
        cost_estimate=pl.CostEstimate(
            flops=flops, transcendentals=B * C,
            bytes_accessed=bytes_accessed),
        input_output_aliases=({0: 0} if donate_x else {}),
    )(x3, w1, w2)

    if pad:
        out = out[:, :, :hw]
    return out.reshape(B, C, H, W)


# Pure-JAX reference (mirrors the PyTorch module exactly; fc layers bias-free).
def se_layer_ref(x, w1, w2):
    y = jnp.mean(x, axis=(2, 3))                               # (B, C)
    z = jnp.maximum(y @ w1.T, 0.0)                             # (B, C//r)
    s = jax.nn.sigmoid(z @ w2.T)                               # (B, C)
    return x * s[:, :, None, None]


# ----------------------------------------------------------------------------
# Main
# ----------------------------------------------------------------------------
if __name__ == "__main__":
    B, C, H, W = 2, 64, 16, 16
    reduction = 16
    Cr = C // reduction

    root = jax.random.PRNGKey(0)
    k_x, k_w1, k_w2 = jax.random.split(root, 3)

    x = jax.random.normal(k_x, (B, C, H, W), jnp.float32)
    # nn.Linear-style init, PyTorch (out_features, in_features) layout, no bias.
    w1 = jax.random.uniform(k_w1, (Cr, C), jnp.float32,
                            minval=-1.0, maxval=1.0) * (1.0 / C) ** 0.5
    w2 = jax.random.uniform(k_w2, (C, Cr), jnp.float32,
                            minval=-1.0, maxval=1.0) * (1.0 / Cr) ** 0.5

    out = jax.jit(se_layer)(x, w1, w2)
    out = jax.block_until_ready(out)

    ref = se_layer_ref(x, w1, w2)
    assert out.shape == (B, C, H, W), out.shape
    assert jnp.isfinite(out).all()
    assert jnp.allclose(out, ref, atol=1e-5, rtol=1e-5), \
        float(jnp.max(jnp.abs(out - ref)))
    print("KERNEL_OK")
</pallas_src>

<mosaic_0001>
module attributes {stable_mosaic.version = 11 : i64} {
  func.func @_se_kernel(%arg0: i32, %arg1: memref<1x64x256xf32, #tpu.memory_space<vmem>>, %arg2: memref<4x64xf32, #tpu.memory_space<vmem>>, %arg3: memref<64x4xf32, #tpu.memory_space<vmem>>, %arg4: memref<1x64x256xf32, #tpu.memory_space<vmem>>) attributes {dimension_semantics = [#tpu.dimension_semantics<parallel>], iteration_bounds = array<i64: 2>, scalar_prefetch = 0 : i64, scratch_operands = 0 : i64, tpu.core_type = #tpu.core_type<tc>, window_params = [{transform_indices = @transform_0, window_bounds = array<i64: 1, 64, 256>}, {pipeline_mode = #tpu.pipeline_mode<synchronous>, transform_indices = @transform_1, window_bounds = array<i64: 4, 64>}, {pipeline_mode = #tpu.pipeline_mode<synchronous>, transform_indices = @transform_2, window_bounds = array<i64: 64, 4>}, {transform_indices = @transform_3, window_bounds = array<i64: 1, 64, 256>}]} {
    %c0 = arith.constant 0 : index
    %c0_0 = arith.constant 0 : index
    %c0_1 = arith.constant 0 : index
    %0 = vector.load %arg1[%c0, %c0_0, %c0_1] : memref<1x64x256xf32, #tpu.memory_space<vmem>>, vector<1x64x256xf32>
    %cst = arith.constant dense<0.000000e+00> : vector<1x64xf32>
    %1 = vector.multi_reduction <add>, %0, %cst [2] : vector<1x64x256xf32> to vector<1x64xf32>
    %cst_2 = arith.constant 3.906250e-03 : f32
    %2 = vector.broadcast %cst_2 : f32 to vector<1x64xf32>
    %3 = arith.mulf %1, %2 : vector<1x64xf32>
    %c0_3 = arith.constant 0 : index
    %c0_4 = arith.constant 0 : index
    %4 = vector.load %arg2[%c0_3, %c0_4] : memref<4x64xf32, #tpu.memory_space<vmem>>, vector<4x64xf32>
    %cst_5 = arith.constant dense<0.000000e+00> : vector<1x4xf32>
    %5 = tpu.matmul %3, %4, %cst_5 {dimension_numbers = #tpu.dot_dimension_numbers<[1], [1], [0], [0], [0, 0, 1, 0], [], []>} : vector<1x64xf32>, vector<4x64xf32>, vector<1x4xf32> -> vector<1x4xf32>
    %cst_6 = arith.constant 0.000000e+00 : f32
    %6 = vector.broadcast %cst_6 : f32 to vector<1x4xf32>
    %7 = arith.maximumf %5, %6 : vector<1x4xf32>
    %c0_7 = arith.constant 0 : index
    %c0_8 = arith.constant 0 : index
    %8 = vector.load %arg3[%c0_7, %c0_8] : memref<64x4xf32, #tpu.memory_space<vmem>>, vector<64x4xf32>
    %cst_9 = arith.constant dense<0.000000e+00> : vector<1x64xf32>
    %9 = tpu.matmul %7, %8, %cst_9 {dimension_numbers = #tpu.dot_dimension_numbers<[1], [1], [0], [0], [0, 0, 1, 0], [], []>} : vector<1x4xf32>, vector<64x4xf32>, vector<1x64xf32> -> vector<1x64xf32>
    %10 = arith.negf %9 : vector<1x64xf32>
    %11 = math.exp %10 : vector<1x64xf32>
    %cst_10 = arith.constant 1.000000e+00 : f32
    %12 = vector.broadcast %cst_10 : f32 to vector<1x64xf32>
    %13 = arith.addf %12, %11 : vector<1x64xf32>
    %14 = arith.divf %12, %13 : vector<1x64xf32>
    %c0_11 = arith.constant 0 : index
    %c0_12 = arith.constant 0 : index
    %c0_13 = arith.constant 0 : index
    %15 = vector.load %arg1[%c0_11, %c0_12, %c0_13] : memref<1x64x256xf32, #tpu.memory_space<vmem>>, vector<1x64x256xf32>
    %16 = vector.shape_cast %14 : vector<1x64xf32> to vector<1x64x1xf32>
    %17 = vector.broadcast %16 : vector<1x64x1xf32> to vector<1x64x256xf32>
    %18 = arith.mulf %15, %17 : vector<1x64x256xf32>
    %c0_14 = arith.constant 0 : index
    %c0_15 = arith.constant 0 : index
    %c0_16 = arith.constant 0 : index
    %19 = vector.load %arg4[%c0_14, %c0_15, %c0_16] : memref<1x64x256xf32, #tpu.memory_space<vmem>>, vector<1x64x256xf32>
    tpu.vector_store %arg4[%c0_14, %c0_15, %c0_16], %18 {strides = array<i32>} : memref<1x64x256xf32, #tpu.memory_space<vmem>>, vector<1x64x256xf32>,
    return
  }
  func.func @transform_0(%arg0: i32) -> (i32, i32, i32) {
    %c0_i32 = arith.constant 0 : i32
    %c0_i32_0 = arith.constant 0 : i32
    %c0_i32_1 = arith.constant 0 : i32
    return %arg0, %c0_i32, %c0_i32_0 : i32, i32, i32
  }
  func.func @transform_1(%arg0: i32) -> (i32, i32) {
    %c0_i32 = arith.constant 0 : i32
    %c0_i32_0 = arith.constant 0 : i32
    %c0_i32_1 = arith.constant 0 : i32
    return %c0_i32, %c0_i32_0 : i32, i32
  }
  func.func @transform_2(%arg0: i32) -> (i32, i32) {
    %c0_i32 = arith.constant 0 : i32
    %c0_i32_0 = arith.constant 0 : i32
    %c0_i32_1 = arith.constant 0 : i32
    return %c0_i32, %c0_i32_0 : i32, i32
  }
  func.func @transform_3(%arg0: i32) -> (i32, i32, i32) {
    %c0_i32 = arith.constant 0 : i32
    %c0_i32_0 = arith.constant 0 : i32
    %c0_i32_1 = arith.constant 0 : i32
    return %arg0, %c0_i32, %c0_i32_0 : i32, i32, i32
  }
}

</mosaic_0001>

<bundles_post_ra>
// kernel: se_layer.1
= control target key start
LH: loop header
LB: loop body
LE: loop exit
PB: predicated region body
PF: predicated region fallthrough
CT: control target
= control target key end

     0   :  { %s716_s12 = smov 0   ;;  %s878_s0 = inlined_call_operand.vmem [shape: f32[2,64,256], index: 0, kind: input, shape index: {}]   ;;  %s879_s1 = inlined_call_operand.vmem [shape: f32[4,64], index: 1, kind: input, shape index: {}]   ;;  %s880_s2 = inlined_call_operand.vmem [shape: f32[64,4], index: 2, kind: input, shape index: {}]   ;;  %s881_s3 = inlined_call_operand.vmem [shape: f32[2,64,256], index: 3, kind: output, shape index: {}]  }
   0x1 LB: > { %s594_s13 = sadd.s32 4294967295, %s691_s12   ;;  %p598_p0 = scmp.ge.s32.totalorder %s691_s12, 1  ;;  %s691_s12 = sphi %s716_s12, %s13_s12  }
   0x2   : > { %p137_p1 = scmp.lt.s32.totalorder %s691_s12, 3 }
   0x4   : > { %p138_p2 = pnand %p598_p0, %p137_p1 }
   0x5   : > { %p161_p3 = scmp.lt.s32.totalorder (!%p138_p2), %s594_s13, 1  ;;  %v693_v24 = vmov (!%p138_p2), 0.0   ;;  %v219_v25 = vld [vmem:[%s879_s1] sm:$0xf] (!%p138_p2)  ;;  %vm283_vm0 = vcmask (!%p138_p2), 523264   ;;  %vm694_vm1 = vmmov (!%p138_p2), 0   ;;  %v228_v40 = vlaneseq (!%p138_p2) }
   0x6   : > { %141 = sbr.rel (%p138_p2) target bundleno = 767 (0x2ff), region = 32  ;;  %630 = vmatprep.subr.mxu0 (!%p138_p2), %v693_v24  ;;  %632 = vmatprep.mubr.msk.f32.mxu0 (!%p138_p2), %vm694_vm1, %v693_v24  ;;  %v360_v26 = vld [vmem:[%s880_s2] sm:$0xff] (!%p138_p2)  ;;  %v361_v27 = vld [vmem:[%s880_s2 + $0x8] sm:$0xff] (!%p138_p2)  ;;  %vm368_vm2 = vcmask (!%p138_p2), 31744   ;;  %v695_v28 = vmov (!%p138_p2), 0.0|0.0   ;;  %v362_v31 = vld [vmem:[%s880_s2 + $0x10] sm:$0xff] (!%p138_p2) }
   0x7   : > { %631 = vmatpush3.xpose.msk.msra.mxu0 (!%p138_p2), %vm283_vm0, %v219_v25  ;;  %651 = vmatprep.mubr.msk.f32.mxu1 (!%p138_p2), %vm694_vm1, %v693_v24  ;;  %v655_v29 = vpack.c.bf16 (!%p138_p2), %v361_v27, %v360_v26  ;;  %vm792_vm3 = vmpackc.low (!%p138_p2), %vm368_vm2, %vm368_vm2  ;;  %v363_v32 = vld [vmem:[%s880_s2 + $0x18] sm:$0xff] (!%p138_p2)  ;;  %v364_v34 = vld [vmem:[%s880_s2 + $0x20] sm:$0xff] (!%p138_p2)  ;;  %v229_v41 = vand.u32 (!%p138_p2), 127, %v228_v40  ;;  %v822_v42 = vshrl.u32 (!%p138_p2), %v228_v40, 7  ;;  %vm239_vm4 = vcmask (!%p138_p2), 130112  }
   0x8   : > { %654 = vmatprep.subr.bf16.mxu1 (!%p138_p2), %v695_v28  ;;  %v659_v33 = vpack.c.bf16 (!%p138_p2), %v363_v32, %v362_v31  ;;  %v365_v35 = vld [vmem:[%s880_s2 + $0x28] sm:$0xff] (!%p138_p2)  ;;  %v366_v37 = vld [vmem:[%s880_s2 + $0x30] sm:$0xff] (!%p138_p2)  ;;  %v367_v38 = vld [vmem:[%s880_s2 + $0x38] sm:$0xff] (!%p138_p2)  ;;  %vm246_vm5 = vcmask (!%p138_p2), 195712   ;;  %vm253_vm6 = vcmask (!%p138_p2), 261312   ;;  %vm260_vm7 = vcmask (!%p138_p2), 326912  }
   0x9   : > { %657 = vmatpush3.bf16.xpose.msk.msra.mxu1 (!%p138_p2), %vm792_vm3, %v655_v29  ;;  %v663_v36 = vpack.c.bf16 (!%p138_p2), %v365_v35, %v364_v34  ;;  %v667_v39 = vpack.c.bf16 (!%p138_p2), %v367_v38, %v366_v37  ;;  %v234_v43 = vadd.s32 (!%p138_p2), 4294967288, %v229_v41  ;;  %v241_v45 = vadd.s32 (!%p138_p2), 4294967280, %v229_v41 }
   0xa   : > { %658 = vmatprep.subr.bf16.mxu1 (!%p138_p2), %v695_v28  ;;  %v248_v46 = vadd.s32 (!%p138_p2), 4294967272, %v229_v41  ;;  %v232_v48 = vsub.s32 (!%p138_p2), %v229_v41, %v822_v42  ;;  %v255_v51 = vadd.s32 (!%p138_p2), 4294967264, %v229_v41  ;;  %v262_v56 = vadd.s32 (!%p138_p2), 4294967256, %v229_v41 }
   0xb   : > { %v237_v50 = vsub.s32 (!%p138_p2), %v234_v43, %v822_v42  ;;  %v244_v52 = vsub.s32 (!%p138_p2), %v241_v45, %v822_v42  ;;  %v269_v63 = vadd.s32 (!%p138_p2), 4294967248, %v229_v41  ;;  %vm267_vm8 = vcmask (!%p138_p2), 392512  }
   0xc   : > { %v251_v55 = vsub.s32 (!%p138_p2), %v248_v46, %v822_v42  ;;  %v258_v62 = vsub.s32 (!%p138_p2), %v255_v51, %v822_v42  ;;  %vm274_vm9 = vcmask (!%p138_p2), 458112   ;;  %vm281_vm10 = vcmask (!%p138_p2), 523712  }
   0xd   : > { %s885_s13 = smov (!%p161_p3, %s594_s13), 1 }
   0xe   : > { %s617_s14 = sshll.u32 %s885_s13, 7 }
   0xf   : > { %s165_s17 = scalar_lea.vmem %s878_s0, %s617_s14  ;;  %s841_s11 = scalar_lea.vmem %s881_s3, %s617_s14 }
  0x10   : > { %v732_v0 = vld [vmem:[%s165_s17] sm:$0xff]  ;;  %v734_v1 = vld [vmem:[%s165_s17 + $0x8] sm:$0xff]  ;;  %v742_v5 = vld [vmem:[%s165_s17 + $0x10] sm:$0xff] }
  0x11   : > { %v736_v2 = vld [vmem:[%s165_s17 + $0x20] sm:$0xff]  ;;  %v187_v3 = vadd.f32 %v734_v1, %v732_v0  ;;  %v740_v4 = vld [vmem:[%s165_s17 + $0x28] sm:$0xff]  ;;  %v744_v6 = vld [vmem:[%s165_s17 + $0x18] sm:$0xff]  ;;  %661 = vmatpush3.bf16.xpose.msk.msra.mxu1 %vm792_vm3, %v659_v33 }
  0x12   : > { %v193_v7 = vadd.f32 %v740_v4, %v736_v2  ;;  %v748_v8 = vld [vmem:[%s165_s17 + $0x30] sm:$0xff]  ;;  %v750_v9 = vld [vmem:[%s165_s17 + $0x38] sm:$0xff]  ;;  %v190_v10 = vadd.f32 %v744_v6, %v742_v5  ;;  %v756_v12 = vld [vmem:[%s165_s17 + $0x40] sm:$0xff]  ;;  %662 = vmatprep.subr.bf16.mxu1 %v695_v28 }
  0x13   : > { %188 = vadd.xlane.f32.xlu0 %v187_v3  ;;  %v196_v11 = vadd.f32 %v750_v9, %v748_v8  ;;  %v758_v13 = vld [vmem:[%s165_s17 + $0x48] sm:$0xff]  ;;  %v760_v14 = vld [vmem:[%s165_s17 + $0x50] sm:$0xff]  ;;  %v762_v15 = vld [vmem:[%s165_s17 + $0x58] sm:$0xff] }
  0x14   : > { %194 = vadd.xlane.f32.xlu1 %v193_v7  ;;  %v199_v16 = vadd.f32 %v758_v13, %v756_v12  ;;  %v202_v17 = vadd.f32 %v762_v15, %v760_v14  ;;  %v768_v18 = vld [vmem:[%s165_s17 + $0x60] sm:$0xff]  ;;  %v770_v19 = vld [vmem:[%s165_s17 + $0x68] sm:$0xff]  ;;  %v772_v20 = vld [vmem:[%s165_s17 + $0x70] sm:$0xff] }
  0x15   : > { %v774_v21 = vld [vmem:[%s165_s17 + $0x78] sm:$0xff]  ;;  %v205_v22 = vadd.f32 %v770_v19, %v768_v18 }
  0x16   : > { %v208_v23 = vadd.f32 %v774_v21, %v772_v20 }
  0x17   : > { %191 = vadd.xlane.f32.xlu0 %v190_v10 }
  0x18   : > { %197 = vadd.xlane.f32.xlu1 %v196_v11  ;;  %v265_v11 = vsub.s32 %v262_v56, %v822_v42 }
  0x19   : > { %665 = vmatpush3.bf16.xpose.msk.msra.mxu1 %vm792_vm3, %v663_v36 }
  0x1a   : > { %666 = vmatprep.subr.bf16.mxu1 %v695_v28  ;;  %v272_v28 = vsub.s32 %v269_v63, %v822_v42 }
  0x1b   : > { %200 = vadd.xlane.f32.xlu0 %v199_v16  ;;  %v276_v16 = vadd.s32 4294967240, %v229_v41 }
  0x1c   : > { %203 = vadd.xlane.f32.xlu1 %v202_v17 }
  0x1d   : > { %v279_v31 = vsub.s32 %v276_v16, %v822_v42 }
  0x1f   : > { %206 = vadd.xlane.f32.xlu0 %v205_v22 }
  0x20   : > { %209 = vadd.xlane.f32.xlu1 %v208_v23 }
  0x21   : > { %669 = vmatpush3.bf16.xpose.msk.msra.mxu1 %vm792_vm3, %v667_v39 }
  0xa0   : > { %v189_v44 = vpop.xlane.xlu0 %188 }
  0xa1   : > { %v195_v47 = vpop.xlane.xlu1 %194  ;;  %v211_v49 = vmul.f32 0.00390625, %v189_v44 }
  0xa2   : > { %v213_v53 = vmul.f32 0.00390625, %v195_v47 }
  0xa3   : > { %v233_v60 = vrot.slane %v211_v49, %v232_v48 }
  0xa4   : > { %v192_v54 = vpop.xlane.xlu0 %191  ;;  %v245_v3 = vrot.slane %v213_v53, %v244_v52 }
  0xa5   : > { %v212_v57 = vmul.f32 0.00390625, %v192_v54  ;;  %v198_v58 = vpop.xlane.xlu1 %197 }
  0xa6   : > { %v214_v59 = vmul.f32 0.00390625, %v198_v58 }
  0xa7   : > { %v238_v61 = vrot.slane %v212_v57, %v237_v50  ;;  %v474_v50 = vsub.s32 0, %v822_v42 }
  0xa8   : > { %v252_v7 = vrot.slane %v214_v59, %v251_v55  ;;  %v201_v10 = vpop.xlane.xlu0 %200 }
  0xa9   : > { %v240_v17 = vsel %vm239_vm4, %v238_v61, %v233_v60  ;;  %v215_v22 = vmul.f32 0.00390625, %v201_v10  ;;  %v204_v23 = vpop.xlane.xlu1 %203 }
  0xaa   : > { %v247_v24 = vsel %vm246_vm5, %v245_v3, %v240_v17  ;;  %v216_v25 = vmul.f32 0.00390625, %v204_v23 }
  0xab   : > { %v254_v26 = vsel %vm253_vm6, %v252_v7, %v247_v24  ;;  %v259_v27 = vrot.slane %v215_v22, %v258_v62 }
  0xac   : > { %v266_v29 = vrot.slane %v216_v25, %v265_v11  ;;  %v207_v30 = vpop.xlane.xlu0 %206 }
  0xad   : > { %v261_v32 = vsel %vm260_vm7, %v259_v27, %v254_v26  ;;  %v217_v33 = vmul.f32 0.00390625, %v207_v30  ;;  %v210_v34 = vpop.xlane.xlu1 %209 }
  0xae   : > { %v218_v35 = vmul.f32 0.00390625, %v210_v34  ;;  %v268_v37 = vsel %vm267_vm8, %v266_v29, %v261_v32 }
  0xaf   : > { %v273_v36 = vrot.slane %v217_v33, %v272_v28 }
  0xb0   : > { %v280_v38 = vrot.slane %v218_v35, %v279_v31 }
  0xb1   : > { %v275_v39 = vsel %vm274_vm9, %v273_v36, %v268_v37 }
  0xb2   : > { %v282_v40 = vsel %vm281_vm10, %v280_v38, %v275_v39 }
  0xb3   : > { %633 = vmatmul.mubr.msk.f32.vlgmr.msra.gmra.mrb[0].mxu0 %vm283_vm0, %v282_v40 }
 0x186   : > { %v355_v41 = vpop.f32.mrb[0].mxu0 }
 0x187   : > { %v359_v43 = vmax.f32 %v355_v41, 0.0  ;;  %v634_v44 = vpop.f32.mrb[1].mxu0 }
 0x189   : > { %652 = vmatmul.mubr.msk.f32.vlgmr.msra.gmra.mrb[0].mxu1 %vm368_vm2, %v359_v43 }
 0x25c   : > { %v462_v45 = vpop.f32.mrb[0].mxu1 }
 0x25d   : > { %v614_v46 = vmul.f32 -1.442695, %v462_v45  ;;  %v653_v47 = vpop.f32.mrb[1].mxu1 }
 0x25f   : > { %681 = vpow2.f32 %v614_v46 }
 0x269   : > { %v682_v48 = vpop.eup %681 }
 0x26a   : > { %v469_v49 = vadd.f32 1.0, %v682_v48 }
 0x26c   : > { %683 = vrcp.f32 %v469_v49 }
 0x276   : > { %v684_v51 = vpop.eup %683 }
 0x277   : > { %v475_v52 = vrot.slane %v684_v51, %v474_v50 }
 0x279   : > { %481 = vbcast.lane.b32.xlu1 %v475_v52, 264  ;;  %477 = vbcast.lane.b32.xlu0 %v475_v52, 256 }
 0x27d   : > { %485 = vbcast.lane.b32.xlu1 %v475_v52, 272  ;;  %493 = vbcast.lane.b32.xlu0 %v475_v52, 288 }
 0x281   : > { %489 = vbcast.lane.b32.xlu1 %v475_v52, 280  ;;  %501 = vbcast.lane.b32.xlu0 %v475_v52, 304 }
 0x285   : > { %497 = vbcast.lane.b32.xlu1 %v475_v52, 296 }
 0x289   : > { %505 = vbcast.lane.b32.xlu1 %v475_v52, 312 }
 0x2eb   : > { %v482_v42 = vpop.permute.xlu1 %481  ;;  %v478_v53 = vpop.permute.xlu0 %477 }
 0x2ec   : > { %v509_v54 = vmul.f32 %v482_v42, %v742_v5  ;;  %v510_v55 = vmul.f32 %v482_v42, %v744_v6  ;;  %v507_v56 = vmul.f32 %v478_v53, %v732_v0  ;;  %v508_v57 = vmul.f32 %v478_v53, %v734_v1 }
 0x2ee   : > { %525 = vst [vmem:[%s841_s11 + $0x10] sm:$0xff] %v509_v54  ;;  %526 = vst [vmem:[%s841_s11 + $0x18] sm:$0xff] %v510_v55 }
 0x2ef   : > { %523 = vst [vmem:[%s841_s11] sm:$0xff] %v507_v56  ;;  %524 = vst [vmem:[%s841_s11 + $0x8] sm:$0xff] %v508_v57  ;;  %v486_v58 = vpop.permute.xlu1 %485  ;;  %v494_v59 = vpop.permute.xlu0 %493 }
 0x2f0   : > { %v511_v60 = vmul.f32 %v486_v58, %v736_v2  ;;  %v512_v5 = vmul.f32 %v486_v58, %v740_v4  ;;  %v515_v6 = vmul.f32 %v494_v59, %v756_v12  ;;  %v516_v0 = vmul.f32 %v494_v59, %v758_v13 }
 0x2f2   : > { %527 = vst [vmem:[%s841_s11 + $0x20] sm:$0xff] %v511_v60  ;;  %528 = vst [vmem:[%s841_s11 + $0x28] sm:$0xff] %v512_v5 }
 0x2f3   : > { %531 = vst [vmem:[%s841_s11 + $0x40] sm:$0xff] %v515_v6  ;;  %532 = vst [vmem:[%s841_s11 + $0x48] sm:$0xff] %v516_v0  ;;  %v490_v1 = vpop.permute.xlu1 %489  ;;  %v502_v61 = vpop.permute.xlu0 %501 }
 0x2f4   : > { %v513_v62 = vmul.f32 %v490_v1, %v748_v8  ;;  %v514_v2 = vmul.f32 %v490_v1, %v750_v9  ;;  %v519_v4 = vmul.f32 %v502_v61, %v768_v18  ;;  %v520_v12 = vmul.f32 %v502_v61, %v770_v19 }
 0x2f6   : > { %529 = vst [vmem:[%s841_s11 + $0x30] sm:$0xff] %v513_v62  ;;  %530 = vst [vmem:[%s841_s11 + $0x38] sm:$0xff] %v514_v2 }
 0x2f7   : > { %535 = vst [vmem:[%s841_s11 + $0x60] sm:$0xff] %v519_v4  ;;  %536 = vst [vmem:[%s841_s11 + $0x68] sm:$0xff] %v520_v12  ;;  %v498_v13 = vpop.permute.xlu1 %497 }
 0x2f8   : > { %v517_v63 = vmul.f32 %v498_v13, %v760_v14  ;;  %v518_v3 = vmul.f32 %v498_v13, %v762_v15 }
 0x2fa   : > { %533 = vst [vmem:[%s841_s11 + $0x50] sm:$0xff] %v517_v63  ;;  %534 = vst [vmem:[%s841_s11 + $0x58] sm:$0xff] %v518_v3 }
 0x2fb   : > { %v506_v8 = vpop.permute.xlu1 %505 }
 0x2fc   : > { %v521_v7 = vmul.f32 %v506_v8, %v772_v20  ;;  %v522_v9 = vmul.f32 %v506_v8, %v774_v21 }
 0x2fe   : > { %537 = vst [vmem:[%s841_s11 + $0x70] sm:$0xff] %v521_v7  ;;  %538 = vst [vmem:[%s841_s11 + $0x78] sm:$0xff] %v522_v9 }
 0x2ff PF: > { %s13_s12 = sadd.s32 1, %s691_s12  }
 0x300   : > { %p10_p4 = scmp.ge.s32.totalorder %s13_s12, 4  }
 0x302   :  { %12 = sbr.rel (!%p10_p4) target bundleno = 1 (0x1), region = 62 }

</bundles_post_ra>
